<compile_context>
chip_gen: v6e
topology: v6e:2x2x1
jax: 0.10.0
libtpu: 0.0.40
codegen_flags: <defaults>
</compile_context>

<pallas_src>
import math

import jax
import jax.numpy as jnp
from jax.experimental import pallas as pl
from jax.experimental.pallas import tpu as pltpu


# ---------------------------------------------------------------------------
# Small helpers
# ---------------------------------------------------------------------------

def _round_up(n, m):
    return ((n + m - 1) // m) * m


def _pad2(a, rows, cols):
    r, c = a.shape
    if r == rows and c == cols:
        return a
    return jnp.pad(a, ((0, rows - r), (0, cols - c)))


# Contract the last dim of x with the last dim of w (w stays in PyTorch
# (out_features, in_features) layout -> no in-kernel transpose / XLU shuffle).
_CONTRACT_LAST = (((1,), (1,)), ((), ()))


# ---------------------------------------------------------------------------
# Fused kernels
# ---------------------------------------------------------------------------

def _linear(h_bf16, w_ref, b_ref, relu):
    """y = h @ w.T + b (bf16 MXU dot, f32 accumulate, optional fused ReLU)."""
    y = jax.lax.dot_general(h_bf16, w_ref[...], dimension_numbers=_CONTRACT_LAST,
                            preferred_element_type=jnp.float32)
    y = y + b_ref[...]
    if relu:
        y = jnp.maximum(y, 0.0)
    return y


def _noisy_linear(h_f32, wmu_ref, wsig_ref, ei_ref, eo_ref, b_ref, relu):
    """NoisyLinear (training) via the rank-1 identity:
       y = h @ mu^T + eps_out ⊙ ((h * eps_in) @ sigma^T) + bias_noisy.
       Two MXU matmuls; only O(tm*(K+N)) VPU work instead of O(N*K)."""
    h_bf = h_f32.astype(jnp.bfloat16)
    y_mu = jax.lax.dot_general(h_bf, wmu_ref[...], dimension_numbers=_CONTRACT_LAST,
                               preferred_element_type=jnp.float32)
    h_sc = (h_f32 * ei_ref[...]).astype(jnp.bfloat16)          # (tm,K) * (1,K)
    y_sig = jax.lax.dot_general(h_sc, wsig_ref[...], dimension_numbers=_CONTRACT_LAST,
                                preferred_element_type=jnp.float32)
    y = y_mu + eo_ref[...] * y_sig + b_ref[...]                # (1,N) row scale
    if relu:
        y = jnp.maximum(y, 0.0)
    return y


def _dqn_fused_train_kernel(x_ref, w1_ref, b1_ref, w2_ref, b2_ref,
                            wmu3_ref, wsig3_ref, ei3_ref, eo3_ref, b3_ref,
                            wmu4_ref, wsig4_ref, ei4_ref, eo4_ref, b4_ref,
                            o_ref):
    h = _linear(x_ref[...], w1_ref, b1_ref, relu=True)                  # feat1
    h = _linear(h.astype(jnp.bfloat16), w2_ref, b2_ref, relu=True)      # feat2
    h = _noisy_linear(h, wmu3_ref, wsig3_ref, ei3_ref, eo3_ref, b3_ref,
                      relu=True)                                        # fc1
    q = _noisy_linear(h, wmu4_ref, wsig4_ref, ei4_ref, eo4_ref, b4_ref,
                      relu=False)                                       # fc2
    o_ref[...] = q.astype(o_ref.dtype)


def _dqn_fused_eval_kernel(x_ref, w1_ref, b1_ref, w2_ref, b2_ref,
                           wmu3_ref, b3_ref, wmu4_ref, b4_ref, o_ref):
    h = _linear(x_ref[...], w1_ref, b1_ref, relu=True)                  # feat1
    h = _linear(h.astype(jnp.bfloat16), w2_ref, b2_ref, relu=True)      # feat2
    h = _linear(h.astype(jnp.bfloat16), wmu3_ref, b3_ref, relu=True)    # fc1 (mu)
    q = _linear(h.astype(jnp.bfloat16), wmu4_ref, b4_ref, relu=False)   # fc2 (mu)
    o_ref[...] = q.astype(o_ref.dtype)


# ---------------------------------------------------------------------------
# Forward wrapper
# ---------------------------------------------------------------------------

def _batch_tile(B):
    """Batch tile (sublane-aligned).  For B >= 16 the batch grid has >= 2
    parallel points so v7x's two TensorCores both get work."""
    Mp = _round_up(B, 8)
    if Mp <= 8:
        return 8, 8
    tm = min(128, _round_up(Mp // 2, 8))
    Mp = _round_up(Mp, tm)
    return tm, Mp


def _full_spec(arr):
    """Full-extent block, constant across the batch grid -> DMA'd once."""
    return pl.BlockSpec(arr.shape, lambda i: (0, 0))


def dqn_forward(x, packed, *, training=True):
    """DQNBase.forward (use_mem=False branch) for the MLP feature path."""
    dims = packed["dims"]
    B, K = x.shape
    assert K == dims["obs_dim"]
    K0p, N4p, num_actions = dims["K0p"], dims["N4p"], dims["num_actions"]

    tm, Mp = _batch_tile(B)
    x_p = _pad2(x.astype(jnp.float32), Mp, K0p).astype(jnp.bfloat16)

    if training:
        kernel = _dqn_fused_train_kernel
        weights = [packed[k] for k in (
            "w1", "b1", "w2", "b2",
            "wmu3", "wsig3", "ei3", "eo3", "b3_noisy",
            "wmu4", "wsig4", "ei4", "eo4", "b4_noisy")]
    else:
        # Eval: mu-only kernel, sigma / epsilon bytes never leave HBM.
        kernel = _dqn_fused_eval_kernel
        weights = [packed[k] for k in (
            "w1", "b1", "w2", "b2", "wmu3", "b3_mu", "wmu4", "b4_mu")]

    in_specs = [pl.BlockSpec((tm, K0p), lambda i: (i, 0))]
    in_specs += [_full_spec(w) for w in weights]
    out_specs = pl.BlockSpec((tm, N4p), lambda i: (i, 0))

    # Right-size the VMEM request from the actual block footprint:
    # double-buffered per-step blocks + headroom for in-kernel intermediates.
    block_in = tm * K0p * 2 + sum(int(w.size) * w.dtype.itemsize for w in weights)
    block_out = tm * N4p * 4
    scratch_est = 8 * tm * 512 * 4
    vmem_limit = int(min(32 * 1024 * 1024,
                         max(4 * 1024 * 1024,
                             2 * (2 * (block_in + block_out) + scratch_est))))

    out_p = pl.pallas_call(
        kernel,
        out_shape=jax.ShapeDtypeStruct((Mp, N4p), jnp.float32),
        grid_spec=pltpu.PrefetchScalarGridSpec(
            num_scalar_prefetch=0,
            grid=(Mp // tm,),
            in_specs=in_specs,
            out_specs=out_specs,
        ),
        compiler_params=pltpu.CompilerParams(
            dimension_semantics=("parallel",),
            vmem_limit_bytes=vmem_limit,
        ),
    )(x_p, *weights)

    q = out_p[:B, :num_actions]
    return q, q, q, q


# ---------------------------------------------------------------------------
# Parameter / noise construction (plain-JAX glue mirroring the PyTorch module)
# ---------------------------------------------------------------------------

def _scale_noise(key, shape):
    x = jax.random.normal(key, shape, dtype=jnp.float32)
    return jnp.sign(x) * jnp.sqrt(jnp.abs(x))


def make_linear_params(key, in_f, out_f):
    # weights_init: kaiming_normal_(relu) weights, zero bias for plain nn.Linear.
    std = math.sqrt(2.0 / in_f)
    w = std * jax.random.normal(key, (out_f, in_f), dtype=jnp.float32)
    b = jnp.zeros((out_f,), jnp.float32)
    return dict(weight=w, bias=b)


def make_noisy_linear_params(key, in_f, out_f, sigma_init):
    k_wmu, k_bmu, k_ei, k_eo, k_eb = jax.random.split(key, 5)
    mu_range = 1.0 / math.sqrt(in_f)
    return dict(
        weight_mu=jax.random.uniform(k_wmu, (out_f, in_f), jnp.float32,
                                     -mu_range, mu_range),
        weight_sigma=jnp.full((out_f, in_f), sigma_init / math.sqrt(in_f),
                              jnp.float32),
        bias_mu=jax.random.uniform(k_bmu, (out_f,), jnp.float32,
                                   -mu_range, mu_range),
        bias_sigma=jnp.full((out_f,), sigma_init / math.sqrt(out_f),
                            jnp.float32),
        # sample_noise(): keep the rank-1 factors; never build ger()/outer.
        eps_in=_scale_noise(k_ei, (in_f,)),
        eps_out=_scale_noise(k_eo, (out_f,)),
        bias_eps=_scale_noise(k_eb, (out_f,)),
    )


def make_dqn_params(key, obs_dim, num_actions, sigma_init=0.5, hidden_fc=512):
    k1, k2, k3, k4 = jax.random.split(key, 4)
    return dict(
        feat1=make_linear_params(k1, obs_dim, 32),            # nn.Linear(obs, 32)
        feat2=make_linear_params(k2, 32, 64),                 # nn.Linear(32, 64)
        fc1=make_noisy_linear_params(k3, 64, hidden_fc, sigma_init),
        fc2=make_noisy_linear_params(k4, hidden_fc, num_actions, sigma_init),
    )


def pack_dqn_params(params):
    """Pad to (8,128)-aligned shapes and cast weights to bf16 ONCE.
    Padded rows/cols are zero so padded intermediate columns stay zero."""
    f1, f2, fc1, fc2 = params["feat1"], params["feat2"], params["fc1"], params["fc2"]
    obs_dim = f1["weight"].shape[1]
    n1 = f1["weight"].shape[0]
    n2 = f2["weight"].shape[0]
    n3 = fc1["weight_mu"].shape[0]
    num_actions = fc2["weight_mu"].shape[0]

    K0p = _round_up(obs_dim, 128)
    N1p = _round_up(n1, 128)
    N2p = _round_up(n2, 128)
    N3p = _round_up(n3, 128)
    N4p = _round_up(num_actions, 128)

    def pw(w, np_, kp):   # padded bf16 weight, (out, in) layout
        return _pad2(w.astype(jnp.float32), np_, kp).astype(jnp.bfloat16)

    def pv(v, np_):       # padded f32 row-vector (1, np_)
        return _pad2(v.reshape(1, -1).astype(jnp.float32), 1, np_)

    return dict(
        w1=pw(f1["weight"], N1p, K0p), b1=pv(f1["bias"], N1p),
        w2=pw(f2["weight"], N2p, N1p), b2=pv(f2["bias"], N2p),
        wmu3=pw(fc1["weight_mu"], N3p, N2p),
        wsig3=pw(fc1["weight_sigma"], N3p, N2p),
        ei3=pv(fc1["eps_in"], N2p), eo3=pv(fc1["eps_out"], N3p),
        b3_noisy=pv(fc1["bias_mu"] + fc1["bias_sigma"] * fc1["bias_eps"], N3p),
        b3_mu=pv(fc1["bias_mu"], N3p),
        wmu4=pw(fc2["weight_mu"], N4p, N3p),
        wsig4=pw(fc2["weight_sigma"], N4p, N3p),
        ei4=pv(fc2["eps_in"], N3p), eo4=pv(fc2["eps_out"], N4p),
        b4_noisy=pv(fc2["bias_mu"] + fc2["bias_sigma"] * fc2["bias_eps"], N4p),
        b4_mu=pv(fc2["bias_mu"], N4p),
        dims=dict(obs_dim=obs_dim, num_actions=num_actions, K0p=K0p, N4p=N4p),
    )


# ---------------------------------------------------------------------------
# Pure-JAX reference (bf16-input / f32-accumulation, full outer-product noise
# weight -> validates the rank-1 two-matmul refactor in the kernel)
# ---------------------------------------------------------------------------

def _ref_lin(x, w, b, relu):
    y = jax.lax.dot_general(
        x.astype(jnp.bfloat16), w.astype(jnp.bfloat16),
        dimension_numbers=_CONTRACT_LAST,
        preferred_element_type=jnp.float32) + b
    return jnp.maximum(y, 0.0) if relu else y


def dqn_forward_ref(x, params, *, training=True):
    h = _ref_lin(x, params["feat1"]["weight"], params["feat1"]["bias"], True)
    h = _ref_lin(h, params["feat2"]["weight"], params["feat2"]["bias"], True)
    for name, relu in (("fc1", True), ("fc2", False)):
        p = params[name]
        if training:
            w = p["weight_mu"] + p["weight_sigma"] * jnp.outer(p["eps_out"], p["eps_in"])
            b = p["bias_mu"] + p["bias_sigma"] * p["bias_eps"]
        else:
            w, b = p["weight_mu"], p["bias_mu"]
        h = _ref_lin(h, w, b, relu)
    return h


if __name__ == "__main__":
    OBS_DIM, NUM_ACTIONS, BATCH, SIGMA_INIT = 16, 6, 4, 0.5

    key = jax.random.PRNGKey(0)
    k_params, k_x = jax.random.split(key)
    params = make_dqn_params(k_params, OBS_DIM, NUM_ACTIONS, SIGMA_INIT)
    packed = pack_dqn_params(params)          # pad + bf16-cast weights once
    x = jax.random.normal(k_x, (BATCH, OBS_DIM), dtype=jnp.float32)

    # Training-mode forward (factorized noisy weights) and eval-mode (mu-only).
    q_train, _, _, _ = dqn_forward(x, packed, training=True)
    q_train = jax.block_until_ready(q_train)
    q_eval, _, _, _ = dqn_forward(x, packed, training=False)
    q_eval = jax.block_until_ready(q_eval)

    ref_train = dqn_forward_ref(x, params, training=True)
    ref_eval = dqn_forward_ref(x, params, training=False)

    assert q_train.shape == (BATCH, NUM_ACTIONS)
    assert q_eval.shape == (BATCH, NUM_ACTIONS)
    assert jnp.allclose(q_train, ref_train, atol=2e-2, rtol=2e-2), "training mismatch"
    assert jnp.allclose(q_eval, ref_eval, atol=2e-2, rtol=2e-2), "eval mismatch"

    print("KERNEL_OK")
</pallas_src>

<mosaic_0001>
module attributes {stable_mosaic.version = 11 : i64} {
  func.func @_dqn_fused_train_kernel(%arg0: i32, %arg1: memref<8x128xbf16, #tpu.memory_space<vmem>>, %arg2: memref<128x128xbf16, #tpu.memory_space<vmem>>, %arg3: memref<1x128xf32, #tpu.memory_space<vmem>>, %arg4: memref<128x128xbf16, #tpu.memory_space<vmem>>, %arg5: memref<1x128xf32, #tpu.memory_space<vmem>>, %arg6: memref<512x128xbf16, #tpu.memory_space<vmem>>, %arg7: memref<512x128xbf16, #tpu.memory_space<vmem>>, %arg8: memref<1x128xf32, #tpu.memory_space<vmem>>, %arg9: memref<1x512xf32, #tpu.memory_space<vmem>>, %arg10: memref<1x512xf32, #tpu.memory_space<vmem>>, %arg11: memref<128x512xbf16, #tpu.memory_space<vmem>>, %arg12: memref<128x512xbf16, #tpu.memory_space<vmem>>, %arg13: memref<1x512xf32, #tpu.memory_space<vmem>>, %arg14: memref<1x128xf32, #tpu.memory_space<vmem>>, %arg15: memref<1x128xf32, #tpu.memory_space<vmem>>, %arg16: memref<8x128xf32, #tpu.memory_space<vmem>>) attributes {dimension_semantics = [#tpu.dimension_semantics<parallel>], iteration_bounds = array<i64: 1>, scalar_prefetch = 0 : i64, scratch_operands = 0 : i64, tpu.core_type = #tpu.core_type<tc>, window_params = [{transform_indices = @transform_0, window_bounds = array<i64: 8, 128>}, {pipeline_mode = #tpu.pipeline_mode<synchronous>, transform_indices = @transform_1, window_bounds = array<i64: 128, 128>}, {pipeline_mode = #tpu.pipeline_mode<synchronous>, transform_indices = @transform_2, window_bounds = array<i64: 1, 128>}, {pipeline_mode = #tpu.pipeline_mode<synchronous>, transform_indices = @transform_3, window_bounds = array<i64: 128, 128>}, {pipeline_mode = #tpu.pipeline_mode<synchronous>, transform_indices = @transform_4, window_bounds = array<i64: 1, 128>}, {pipeline_mode = #tpu.pipeline_mode<synchronous>, transform_indices = @transform_5, window_bounds = array<i64: 512, 128>}, {pipeline_mode = #tpu.pipeline_mode<synchronous>, transform_indices = @transform_6, window_bounds = array<i64: 512, 128>}, {pipeline_mode = #tpu.pipeline_mode<synchronous>, transform_indices = @transform_7, window_bounds = array<i64: 1, 128>}, {pipeline_mode = #tpu.pipeline_mode<synchronous>, transform_indices = @transform_8, window_bounds = array<i64: 1, 512>}, {pipeline_mode = #tpu.pipeline_mode<synchronous>, transform_indices = @transform_9, window_bounds = array<i64: 1, 512>}, {pipeline_mode = #tpu.pipeline_mode<synchronous>, transform_indices = @transform_10, window_bounds = array<i64: 128, 512>}, {pipeline_mode = #tpu.pipeline_mode<synchronous>, transform_indices = @transform_11, window_bounds = array<i64: 128, 512>}, {pipeline_mode = #tpu.pipeline_mode<synchronous>, transform_indices = @transform_12, window_bounds = array<i64: 1, 512>}, {pipeline_mode = #tpu.pipeline_mode<synchronous>, transform_indices = @transform_13, window_bounds = array<i64: 1, 128>}, {pipeline_mode = #tpu.pipeline_mode<synchronous>, transform_indices = @transform_14, window_bounds = array<i64: 1, 128>}, {transform_indices = @transform_15, window_bounds = array<i64: 8, 128>}]} {
    %c0 = arith.constant 0 : index
    %c0_0 = arith.constant 0 : index
    %0 = vector.load %arg1[%c0, %c0_0] : memref<8x128xbf16, #tpu.memory_space<vmem>>, vector<8x128xbf16>
    %c0_1 = arith.constant 0 : index
    %c0_2 = arith.constant 0 : index
    %1 = vector.load %arg2[%c0_1, %c0_2] : memref<128x128xbf16, #tpu.memory_space<vmem>>, vector<128x128xbf16>
    %cst = arith.constant dense<0.000000e+00> : vector<8x128xf32>
    %2 = tpu.matmul %0, %1, %cst {dimension_numbers = #tpu.dot_dimension_numbers<[1], [1], [0], [0], [0, 0, 1, 0], [], []>} : vector<8x128xbf16>, vector<128x128xbf16>, vector<8x128xf32> -> vector<8x128xf32>
    %c0_3 = arith.constant 0 : index
    %c0_4 = arith.constant 0 : index
    %3 = vector.load %arg3[%c0_3, %c0_4] : memref<1x128xf32, #tpu.memory_space<vmem>>, vector<1x128xf32>
    %4 = vector.broadcast %3 : vector<1x128xf32> to vector<8x128xf32>
    %5 = arith.addf %2, %4 : vector<8x128xf32>
    %cst_5 = arith.constant 0.000000e+00 : f32
    %6 = vector.broadcast %cst_5 : f32 to vector<8x128xf32>
    %7 = arith.maximumf %5, %6 : vector<8x128xf32>
    %8 = arith.truncf %7 : vector<8x128xf32> to vector<8x128xbf16>
    %c0_6 = arith.constant 0 : index
    %c0_7 = arith.constant 0 : index
    %9 = vector.load %arg4[%c0_6, %c0_7] : memref<128x128xbf16, #tpu.memory_space<vmem>>, vector<128x128xbf16>
    %cst_8 = arith.constant dense<0.000000e+00> : vector<8x128xf32>
    %10 = tpu.matmul %8, %9, %cst_8 {dimension_numbers = #tpu.dot_dimension_numbers<[1], [1], [0], [0], [0, 0, 1, 0], [], []>} : vector<8x128xbf16>, vector<128x128xbf16>, vector<8x128xf32> -> vector<8x128xf32>
    %c0_9 = arith.constant 0 : index
    %c0_10 = arith.constant 0 : index
    %11 = vector.load %arg5[%c0_9, %c0_10] : memref<1x128xf32, #tpu.memory_space<vmem>>, vector<1x128xf32>
    %12 = vector.broadcast %11 : vector<1x128xf32> to vector<8x128xf32>
    %13 = arith.addf %10, %12 : vector<8x128xf32>
    %cst_11 = arith.constant 0.000000e+00 : f32
    %14 = vector.broadcast %cst_11 : f32 to vector<8x128xf32>
    %15 = arith.maximumf %13, %14 : vector<8x128xf32>
    %16 = arith.truncf %15 : vector<8x128xf32> to vector<8x128xbf16>
    %c0_12 = arith.constant 0 : index
    %c0_13 = arith.constant 0 : index
    %17 = vector.load %arg6[%c0_12, %c0_13] : memref<512x128xbf16, #tpu.memory_space<vmem>>, vector<512x128xbf16>
    %cst_14 = arith.constant dense<0.000000e+00> : vector<8x512xf32>
    %18 = tpu.matmul %16, %17, %cst_14 {dimension_numbers = #tpu.dot_dimension_numbers<[1], [1], [0], [0], [0, 0, 1, 0], [], []>} : vector<8x128xbf16>, vector<512x128xbf16>, vector<8x512xf32> -> vector<8x512xf32>
    %c0_15 = arith.constant 0 : index
    %c0_16 = arith.constant 0 : index
    %19 = vector.load %arg8[%c0_15, %c0_16] : memref<1x128xf32, #tpu.memory_space<vmem>>, vector<1x128xf32>
    %20 = vector.broadcast %19 : vector<1x128xf32> to vector<8x128xf32>
    %21 = arith.mulf %15, %20 : vector<8x128xf32>
    %22 = arith.truncf %21 : vector<8x128xf32> to vector<8x128xbf16>
    %c0_17 = arith.constant 0 : index
    %c0_18 = arith.constant 0 : index
    %23 = vector.load %arg7[%c0_17, %c0_18] : memref<512x128xbf16, #tpu.memory_space<vmem>>, vector<512x128xbf16>
    %cst_19 = arith.constant dense<0.000000e+00> : vector<8x512xf32>
    %24 = tpu.matmul %22, %23, %cst_19 {dimension_numbers = #tpu.dot_dimension_numbers<[1], [1], [0], [0], [0, 0, 1, 0], [], []>} : vector<8x128xbf16>, vector<512x128xbf16>, vector<8x512xf32> -> vector<8x512xf32>
    %c0_20 = arith.constant 0 : index
    %c0_21 = arith.constant 0 : index
    %25 = vector.load %arg9[%c0_20, %c0_21] : memref<1x512xf32, #tpu.memory_space<vmem>>, vector<1x512xf32>
    %26 = vector.broadcast %25 : vector<1x512xf32> to vector<8x512xf32>
    %27 = arith.mulf %26, %24 : vector<8x512xf32>
    %28 = arith.addf %18, %27 : vector<8x512xf32>
    %c0_22 = arith.constant 0 : index
    %c0_23 = arith.constant 0 : index
    %29 = vector.load %arg10[%c0_22, %c0_23] : memref<1x512xf32, #tpu.memory_space<vmem>>, vector<1x512xf32>
    %30 = vector.broadcast %29 : vector<1x512xf32> to vector<8x512xf32>
    %31 = arith.addf %28, %30 : vector<8x512xf32>
    %cst_24 = arith.constant 0.000000e+00 : f32
    %32 = vector.broadcast %cst_24 : f32 to vector<8x512xf32>
    %33 = arith.maximumf %31, %32 : vector<8x512xf32>
    %34 = arith.truncf %33 : vector<8x512xf32> to vector<8x512xbf16>
    %c0_25 = arith.constant 0 : index
    %c0_26 = arith.constant 0 : index
    %35 = vector.load %arg11[%c0_25, %c0_26] : memref<128x512xbf16, #tpu.memory_space<vmem>>, vector<128x512xbf16>
    %cst_27 = arith.constant dense<0.000000e+00> : vector<8x128xf32>
    %36 = tpu.matmul %34, %35, %cst_27 {dimension_numbers = #tpu.dot_dimension_numbers<[1], [1], [0], [0], [0, 0, 1, 0], [], []>} : vector<8x512xbf16>, vector<128x512xbf16>, vector<8x128xf32> -> vector<8x128xf32>
    %c0_28 = arith.constant 0 : index
    %c0_29 = arith.constant 0 : index
    %37 = vector.load %arg13[%c0_28, %c0_29] : memref<1x512xf32, #tpu.memory_space<vmem>>, vector<1x512xf32>
    %38 = vector.broadcast %37 : vector<1x512xf32> to vector<8x512xf32>
    %39 = arith.mulf %33, %38 : vector<8x512xf32>
    %40 = arith.truncf %39 : vector<8x512xf32> to vector<8x512xbf16>
    %c0_30 = arith.constant 0 : index
    %c0_31 = arith.constant 0 : index
    %41 = vector.load %arg12[%c0_30, %c0_31] : memref<128x512xbf16, #tpu.memory_space<vmem>>, vector<128x512xbf16>
    %cst_32 = arith.constant dense<0.000000e+00> : vector<8x128xf32>
    %42 = tpu.matmul %40, %41, %cst_32 {dimension_numbers = #tpu.dot_dimension_numbers<[1], [1], [0], [0], [0, 0, 1, 0], [], []>} : vector<8x512xbf16>, vector<128x512xbf16>, vector<8x128xf32> -> vector<8x128xf32>
    %c0_33 = arith.constant 0 : index
    %c0_34 = arith.constant 0 : index
    %43 = vector.load %arg14[%c0_33, %c0_34] : memref<1x128xf32, #tpu.memory_space<vmem>>, vector<1x128xf32>
    %44 = vector.broadcast %43 : vector<1x128xf32> to vector<8x128xf32>
    %45 = arith.mulf %44, %42 : vector<8x128xf32>
    %46 = arith.addf %36, %45 : vector<8x128xf32>
    %c0_35 = arith.constant 0 : index
    %c0_36 = arith.constant 0 : index
    %47 = vector.load %arg15[%c0_35, %c0_36] : memref<1x128xf32, #tpu.memory_space<vmem>>, vector<1x128xf32>
    %48 = vector.broadcast %47 : vector<1x128xf32> to vector<8x128xf32>
    %49 = arith.addf %46, %48 : vector<8x128xf32>
    %c0_37 = arith.constant 0 : index
    %c0_38 = arith.constant 0 : index
    %50 = vector.load %arg16[%c0_37, %c0_38] : memref<8x128xf32, #tpu.memory_space<vmem>>, vector<8x128xf32>
    tpu.vector_store %arg16[%c0_37, %c0_38], %49 {strides = array<i32>} : memref<8x128xf32, #tpu.memory_space<vmem>>, vector<8x128xf32>,
    return
  }
  func.func @transform_0(%arg0: i32) -> (i32, i32) {
    %c0_i32 = arith.constant 0 : i32
    %c0_i32_0 = arith.constant 0 : i32
    return %arg0, %c0_i32 : i32, i32
  }
  func.func @transform_1(%arg0: i32) -> (i32, i32) {
    %c0_i32 = arith.constant 0 : i32
    %c0_i32_0 = arith.constant 0 : i32
    %c0_i32_1 = arith.constant 0 : i32
    return %c0_i32, %c0_i32_0 : i32, i32
  }
  func.func @transform_2(%arg0: i32) -> (i32, i32) {
    %c0_i32 = arith.constant 0 : i32
    %c0_i32_0 = arith.constant 0 : i32
    %c0_i32_1 = arith.constant 0 : i32
    return %c0_i32, %c0_i32_0 : i32, i32
  }
  func.func @transform_3(%arg0: i32) -> (i32, i32) {
    %c0_i32 = arith.constant 0 : i32
    %c0_i32_0 = arith.constant 0 : i32
    %c0_i32_1 = arith.constant 0 : i32
    return %c0_i32, %c0_i32_0 : i32, i32
  }
  func.func @transform_4(%arg0: i32) -> (i32, i32) {
    %c0_i32 = arith.constant 0 : i32
    %c0_i32_0 = arith.constant 0 : i32
    %c0_i32_1 = arith.constant 0 : i32
    return %c0_i32, %c0_i32_0 : i32, i32
  }
  func.func @transform_5(%arg0: i32) -> (i32, i32) {
    %c0_i32 = arith.constant 0 : i32
    %c0_i32_0 = arith.constant 0 : i32
    %c0_i32_1 = arith.constant 0 : i32
    return %c0_i32, %c0_i32_0 : i32, i32
  }
  func.func @transform_6(%arg0: i32) -> (i32, i32) {
    %c0_i32 = arith.constant 0 : i32
    %c0_i32_0 = arith.constant 0 : i32
    %c0_i32_1 = arith.constant 0 : i32
    return %c0_i32, %c0_i32_0 : i32, i32
  }
  func.func @transform_7(%arg0: i32) -> (i32, i32) {
    %c0_i32 = arith.constant 0 : i32
    %c0_i32_0 = arith.constant 0 : i32
    %c0_i32_1 = arith.constant 0 : i32
    return %c0_i32, %c0_i32_0 : i32, i32
  }
  func.func @transform_8(%arg0: i32) -> (i32, i32) {
    %c0_i32 = arith.constant 0 : i32
    %c0_i32_0 = arith.constant 0 : i32
    %c0_i32_1 = arith.constant 0 : i32
    return %c0_i32, %c0_i32_0 : i32, i32
  }
  func.func @transform_9(%arg0: i32) -> (i32, i32) {
    %c0_i32 = arith.constant 0 : i32
    %c0_i32_0 = arith.constant 0 : i32
    %c0_i32_1 = arith.constant 0 : i32
    return %c0_i32, %c0_i32_0 : i32, i32
  }
  func.func @transform_10(%arg0: i32) -> (i32, i32) {
    %c0_i32 = arith.constant 0 : i32
    %c0_i32_0 = arith.constant 0 : i32
    %c0_i32_1 = arith.constant 0 : i32
    return %c0_i32, %c0_i32_0 : i32, i32
  }
  func.func @transform_11(%arg0: i32) -> (i32, i32) {
    %c0_i32 = arith.constant 0 : i32
    %c0_i32_0 = arith.constant 0 : i32
    %c0_i32_1 = arith.constant 0 : i32
    return %c0_i32, %c0_i32_0 : i32, i32
  }
  func.func @transform_12(%arg0: i32) -> (i32, i32) {
    %c0_i32 = arith.constant 0 : i32
    %c0_i32_0 = arith.constant 0 : i32
    %c0_i32_1 = arith.constant 0 : i32
    return %c0_i32, %c0_i32_0 : i32, i32
  }
  func.func @transform_13(%arg0: i32) -> (i32, i32) {
    %c0_i32 = arith.constant 0 : i32
    %c0_i32_0 = arith.constant 0 : i32
    %c0_i32_1 = arith.constant 0 : i32
    return %c0_i32, %c0_i32_0 : i32, i32
  }
  func.func @transform_14(%arg0: i32) -> (i32, i32) {
    %c0_i32 = arith.constant 0 : i32
    %c0_i32_0 = arith.constant 0 : i32
    %c0_i32_1 = arith.constant 0 : i32
    return %c0_i32, %c0_i32_0 : i32, i32
  }
  func.func @transform_15(%arg0: i32) -> (i32, i32) {
    %c0_i32 = arith.constant 0 : i32
    %c0_i32_0 = arith.constant 0 : i32
    return %arg0, %c0_i32 : i32, i32
  }
}

</mosaic_0001>

<bundles_post_ra>
// kernel: tpu_custom_call.1
= control target key start
LH: loop header
LB: loop body
LE: loop exit
PB: predicated region body
PF: predicated region fallthrough
CT: control target
= control target key end

     0   :  { %20 = vsyncpa [#allocation3], 0  ;;  %s2636_s0 = inlined_call_operand.hbm [shape: bf16[8,128], index: 0, kind: input, shape index: {}]   ;;  %s2637_s1 = inlined_call_operand.hbm [shape: bf16[128,128], index: 1, kind: input, shape index: {}]   ;;  %s2638_s2 = inlined_call_operand.hbm [shape: f32[1,128], index: 2, kind: input, shape index: {}]   ;;  %s2639_s3 = inlined_call_operand.hbm [shape: bf16[128,128], index: 3, kind: input, shape index: {}]   ;;  %s2640_s4 = inlined_call_operand.hbm [shape: f32[1,128], index: 4, kind: input, shape index: {}]   ;;  %s2641_s5 = inlined_call_operand.hbm [shape: bf16[512,128], index: 5, kind: input, shape index: {}]   ;;  %s2642_s6 = inlined_call_operand.hbm [shape: bf16[512,128], index: 6, kind: input, shape index: {}]   ;;  %s2643_s7 = inlined_call_operand.hbm [shape: f32[1,128], index: 7, kind: input, shape index: {}]   ;;  %s2644_s8 = inlined_call_operand.vmem [shape: f32[1,512], index: 8, kind: input, shape index: {}]   ;;  %s2645_s9 = inlined_call_operand.vmem [shape: f32[1,512], index: 9, kind: input, shape index: {}]   ;;  %s2646_s10 = inlined_call_operand.hbm [shape: bf16[128,512], index: 10, kind: input, shape index: {}]   ;;  %s2647_s11 = inlined_call_operand.hbm [shape: bf16[128,512], index: 11, kind: input, shape index: {}]   ;;  %s2648_s12 = inlined_call_operand.vmem [shape: f32[1,512], index: 12, kind: input, shape index: {}]   ;;  %s2649_s13 = inlined_call_operand.vmem [shape: f32[1,128], index: 13, kind: input, shape index: {}]   ;;  %s2650_s14 = inlined_call_operand.vmem [shape: f32[1,128], index: 14, kind: input, shape index: {}]   ;;  %s2651_s15 = inlined_call_operand.hbm [shape: f32[8,128], index: 15, kind: output, shape index: {}]  }
   0x1   :  { %21 = vsyncpa [#allocation6], 0 }
   0x2   :  { %22 = vsyncpa [#allocation9], 0 }
   0x3   :  { %23 = vsyncpa [#allocation12], 0 }
   0x4   :  { %24 = vsyncpa [#allocation15], 0 }
   0x5   :  { %25 = vsyncpa [#allocation18], 0 }
   0x6   :  { %26 = vsyncpa [#allocation4], 0  ;;  %s2469_s18 = smov [#allocation5]  }
   0x7   :  { %s42_s19 = sshll.u32 %s2469_s18, 4  ;;  %s43_s19 = int_to_ptr.vmem [resolvable:$true] %s42_s19 }
   0x8   :  { %s2243_s20 = scalar_lea.vmem %s43_s19, 1024  ;;  %p2248_p1 = scmp.lt.s32.totalorder %s43_s19, %s43_s19 }
   0x9   :  { %p2244_p0 = scmp.ne.s32.totalorder %s43_s19, %s2243_s20  ;;  %p2249_p2 = scmp.lt.s32.totalorder %s2243_s20, %s2243_s20 }
   0xb   :  { %p2250_p3 = por %p2249_p2, %p2248_p1 }
   0xd   :  { %p2251_p4 = pnand %p2250_p3, %p2244_p0 }
   0xf   :  { %2254 = shalt.err (!%p2251_p4)
}
  0x10   :  { %s2470_s21 = smov 64   ;;  %s2471_s22 = smov 4  }
  0x11   :  { %48 = dma.hbm_to_vmem [thread:$0]  %s2637_s1, 1024, %s43_s19, [#allocation6], %s2470_s21, %s2470_s21, %s2471_s22  }
  0x12   :  { %s2472_s25 = smov [#allocation8]   ;;  %s2473_s27 = smov [#allocation11]  }
  0x13   :  { %s64_s26 = sshll.u32 %s2472_s25, 4  ;;  %s86_s28 = sshll.u32 %s2473_s27, 4  ;;  %s65_s26 = int_to_ptr.vmem [resolvable:$true] %s64_s26  ;;  %s87_s28 = int_to_ptr.vmem [resolvable:$true] %s86_s28 }
  0x14   :  { %s2263_s29 = scalar_lea.vmem %s65_s26, 1024  ;;  %p2268_p6 = scmp.lt.s32.totalorder %s65_s26, %s65_s26 }
  0x15   :  { %p2264_p5 = scmp.ne.s32.totalorder %s65_s26, %s2263_s29  ;;  %p2269_p7 = scmp.lt.s32.totalorder %s2263_s29, %s2263_s29 }
  0x17   :  { %p2270_p8 = por %p2269_p7, %p2268_p6 }
  0x19   :  { %p2271_p9 = pnand %p2270_p8, %p2264_p5 }
  0x1b   :  { %2274 = shalt.err (!%p2271_p9)
}
  0x1c   :  { %70 = dma.hbm_to_vmem [thread:$0]  %s2639_s3, 1024, %s65_s26, [#allocation9], %s2470_s21, %s2470_s21, %s2471_s22  }
  0x1d   :  { %s2283_s1 = scalar_lea.vmem %s87_s28, 4096  ;;  %p2288_p11 = scmp.lt.s32.totalorder %s87_s28, %s87_s28 }
  0x1e   :  { %p2284_p10 = scmp.ne.s32.totalorder %s87_s28, %s2283_s1  ;;  %p2289_p12 = scmp.lt.s32.totalorder %s2283_s1, %s2283_s1 }
  0x20   :  { %p2290_p13 = por %p2289_p12, %p2288_p11 }
  0x22   :  { %p2291_p0 = pnand %p2290_p13, %p2284_p10 }
  0x24   :  { %2294 = shalt.err (!%p2291_p0)
}
  0x25   :  { %92 = dma.hbm_to_vmem [thread:$0]  %s2641_s5, 4096, %s87_s28, [#allocation12], %s2470_s21, %s2470_s21, %s2471_s22  }
  0x26   :  { %s2474_s19 = smov [#allocation14]   ;;  %s2475_s23 = smov [#allocation2]  }
  0x27   :  { %s111_s20 = sshll.u32 %s2474_s19, 4  ;;  %s33_s3 = sshll.u32 %s2475_s23, 4  ;;  %s112_s20 = int_to_ptr.vmem [resolvable:$true] %s111_s20  ;;  %s34_s3 = int_to_ptr.vmem [resolvable:$true] %s33_s3 }
  0x28   :  { %s2303_s24 = scalar_lea.vmem %s112_s20, 16  ;;  %s2307_s25 = scalar_lea.vmem %s112_s20, 32 }
  0x29   :  { %p2304_p1 = scmp.ne.s32.totalorder %s112_s20, %s2303_s24  ;;  %p2308_p2 = scmp.lt.s32.totalorder %s112_s20, %s112_s20 }
  0x2a   :  { %p2309_p3 = scmp.lt.s32.totalorder %s2307_s25, %s2303_s24 }
  0x2c   :  { %p2310_p4 = por %p2309_p3, %p2308_p2 }
  0x2e   :  { %p2311_p5 = pnand %p2310_p4, %p2304_p1 }
  0x30   :  { %2314 = shalt.err (!%p2311_p5)
}
  0x31   :  { %114 = dma.hbm_to_vmem [thread:$0]  %s2643_s7, 16, %s112_s20, [#allocation15]  }
  0x32   :  { %s2323_s29 = scalar_lea.vmem %s34_s3, 64  ;;  %p2328_p7 = scmp.lt.s32.totalorder %s34_s3, %s34_s3 }
  0x33   :  { %p2324_p6 = scmp.ne.s32.totalorder %s34_s3, %s2323_s29  ;;  %p2329_p8 = scmp.lt.s32.totalorder %s2323_s29, %s2323_s29 }
  0x35   :  { %p2330_p9 = por %p2329_p8, %p2328_p7 }
  0x37   :  { %p2331_p10 = pnand %p2330_p9, %p2324_p6 }
  0x39   :  { %2334 = shalt.err (!%p2331_p10)
}
  0x3a   :  { %36 = dma.hbm_to_vmem [thread:$0]  %s2636_s0, 64, %s34_s3, [#allocation3]  }
  0x3b   :  { %s2476_s30 = smov [#allocation7]   ;;  %s2477_s1 = smov [#allocation10]  }
  0x3c   :  { %s55_s16 = sshll.u32 %s2476_s30, 4  ;;  %s77_s17 = sshll.u32 %s2477_s1, 4  ;;  %s56_s16 = int_to_ptr.vmem [resolvable:$true] %s55_s16  ;;  %s78_s17 = int_to_ptr.vmem [resolvable:$true] %s77_s17 }
  0x3d   :  { %s2343_s18 = scalar_lea.vmem %s56_s16, 16  ;;  %s2347_s7 = scalar_lea.vmem %s56_s16, 32 }
  0x3e   :  { %p2344_p11 = scmp.ne.s32.totalorder %s56_s16, %s2343_s18  ;;  %p2348_p12 = scmp.lt.s32.totalorder %s56_s16, %s56_s16 }
  0x3f   :  { %p2349_p13 = scmp.lt.s32.totalorder %s2347_s7, %s2343_s18 }
  0x41   :  { %p2350_p0 = por %p2349_p13, %p2348_p12 }
  0x43   :  { %p2351_p1 = pnand %p2350_p0, %p2344_p11 }
  0x45   :  { %2354 = shalt.err (!%p2351_p1)
}
  0x46   :  { %58 = dma.hbm_to_vmem [thread:$0]  %s2638_s2, 16, %s56_s16, [#allocation6]  }
  0x47   :  { %s2363_s23 = scalar_lea.vmem %s78_s17, 16  ;;  %s2367_s0 = scalar_lea.vmem %s78_s17, 32 }
  0x48   :  { %p2364_p2 = scmp.ne.s32.totalorder %s78_s17, %s2363_s23  ;;  %p2368_p3 = scmp.lt.s32.totalorder %s78_s17, %s78_s17 }
  0x49   :  { %p2369_p4 = scmp.lt.s32.totalorder %s2367_s0, %s2363_s23 }
  0x4b   :  { %p2370_p5 = por %p2369_p4, %p2368_p3 }
  0x4d   :  { %p2371_p6 = pnand %p2370_p5, %p2364_p2 }
  0x4f   :  { %2374 = shalt.err (!%p2371_p6)
}
  0x50   :  { %80 = dma.hbm_to_vmem [thread:$0]  %s2640_s4, 16, %s78_s17, [#allocation9]  }
  0x51   :  { %s2478_s25 = smov [#allocation13]   ;;  %s2479_s27 = smov [#allocation16]  }
  0x52   :  { %s98_s26 = sshll.u32 %s2478_s25, 4  ;;  %s124_s29 = sshll.u32 %s2479_s27, 4  ;;  %s99_s26 = int_to_ptr.vmem [resolvable:$true] %s98_s26  ;;  %s125_s29 = int_to_ptr.vmem [resolvable:$true] %s124_s29 }
  0x53   :  { %s2383_s5 = scalar_lea.vmem %s99_s26, 4096  ;;  %p2388_p8 = scmp.lt.s32.totalorder %s99_s26, %s99_s26 }
  0x54   :  { %p2384_p7 = scmp.ne.s32.totalorder %s99_s26, %s2383_s5  ;;  %p2389_p9 = scmp.lt.s32.totalorder %s2383_s5, %s2383_s5 }
  0x56   :  { %p2390_p10 = por %p2389_p9, %p2388_p8 }
  0x58   :  { %p2391_p11 = pnand %p2390_p10, %p2384_p7 }
  0x5a   :  { %2394 = shalt.err (!%p2391_p11)
}
  0x5b   :  { %104 = dma.hbm_to_vmem [thread:$0]  %s2642_s6, 4096, %s99_s26, [#allocation12], %s2470_s21, %s2470_s21, %s2471_s22  }
  0x5c   :  { %s2403_s4 = scalar_lea.vmem %s125_s29, 4096  ;;  %p2408_p13 = scmp.lt.s32.totalorder %s125_s29, %s125_s29 }
  0x5d   :  { %p2404_p12 = scmp.ne.s32.totalorder %s125_s29, %s2403_s4  ;;  %p2409_p0 = scmp.lt.s32.totalorder %s2403_s4, %s2403_s4 }
  0x5f   :  { %p2410_p1 = por %p2409_p0, %p2408_p13 }
  0x61   :  { %p2411_p2 = pnand %p2410_p1, %p2404_p12 }
  0x63   :  { %2414 = shalt.err (!%p2411_p2)
}
  0x64   :  { %s2480_s30 = smov 256   ;;  %s2481_s16 = smov 16  }
  0x65   :  { %130 = dma.hbm_to_vmem [thread:$0]  %s2646_s10, 4096, %s125_s29, [#allocation15], %s2480_s30, %s2480_s30, %s2481_s16  }
  0x66   :  { %s2482_s18 = smov [#allocation17]  }
  0x67   :  { %s136_s7 = sshll.u32 %s2482_s18, 4  ;;  %s137_s7 = int_to_ptr.vmem [resolvable:$true] %s136_s7 }
  0x68   :  { %s2423_s19 = scalar_lea.vmem %s137_s7, 4096  ;;  %p2428_p4 = scmp.lt.s32.totalorder %s137_s7, %s137_s7 }
  0x69   :  { %p2424_p3 = scmp.ne.s32.totalorder %s137_s7, %s2423_s19  ;;  %p2429_p5 = scmp.lt.s32.totalorder %s2423_s19, %s2423_s19 }
  0x6b   :  { %p2430_p6 = por %p2429_p5, %p2428_p4 }
  0x6d   :  { %p2431_p7 = pnand %p2430_p6, %p2424_p3 }
  0x6f   :  { %2434 = shalt.err (!%p2431_p7)
}
  0x70   :  { %142 = dma.hbm_to_vmem [thread:$0]  %s2647_s11, 4096, %s137_s7, [#allocation18], %s2480_s30, %s2480_s30, %s2481_s16  }
  0x71   :  { %2455 = dma.done.wait [#allocation3], 64  }
  0x72   :  { %2456 = vsyncadd [#allocation3], 4294967232 }
  0x73   :  { %2457 = dma.done.wait [#allocation6], 1040  }
  0x74   :  { %2458 = vsyncadd [#allocation6], 4294966256 }
  0x75   :  { %2459 = dma.done.wait [#allocation9], 1040  }
  0x76   :  { %2460 = vsyncadd [#allocation9], 4294966256 }
  0x77   :  { %2461 = dma.done.wait [#allocation12], 8192  }
  0x78   :  { %2462 = vsyncadd [#allocation12], 4294959104 }
  0x79   :  { %2463 = dma.done.wait [#allocation15], 4112  }
  0x7a   :  { %2464 = vsyncadd [#allocation15], 4294963184 }
  0x7b   :  { %2465 = dma.done.wait [#allocation18], 4096  }
  0x7c   :  { %2466 = vsyncadd [#allocation18], 4294963200  ;;  %v2483_v0 = vmov 0.0   ;;  %vm2484_vm0 = vmmov 0   ;;  %v2059_v1 = vld [vmem:[#allocation5 + $0x38] sm:$0xff]   ;;  %v2060_v2 = vld [vmem:[#allocation5 + $0x30] sm:$0xff]  }
  0x7d   :  { %2002 = vmatprep.subr.bf16.mxu0 %v2483_v0  ;;  %2018 = vmatprep.mubr.msk.bf16.mxu0 %vm2484_vm0, %v2483_v0  ;;  %v2067_v3 = vld [vmem:[#allocation8 + $0x38] sm:$0xff]   ;;  %v2061_v4 = vld [vmem:[#allocation5 + $0x28] sm:$0xff]   ;;  %v2068_v5 = vld [vmem:[#allocation8 + $0x30] sm:$0xff]   ;;  %s2485_s24 = smov [#allocation19]  }
  0x7e   :  { %2022 = vmatprep.subr.bf16.mxu1 %v2483_v0  ;;  %2038 = vmatprep.mubr.msk.bf16.mxu1 %vm2484_vm0, %v2483_v0  ;;  %v2062_v6 = vld [vmem:[#allocation5 + $0x20] sm:$0xff]   ;;  %v2069_v7 = vld [vmem:[#allocation8 + $0x28] sm:$0xff]   ;;  %v2063_v8 = vld [vmem:[#allocation5 + $0x18] sm:$0xff]   ;;  %s1749_s25 = sshll.u32 %s2485_s24, 4  ;;  %s1750_s25 = int_to_ptr.vmem [resolvable:$true] %s1749_s25 }
  0x7f   :  { %2003 = vmatpush3.bf16.xpose.msra.mxu0 %v2059_v1  ;;  %2023 = vmatpush3.bf16.xpose.msra.mxu1 %v2067_v3  ;;  %v2070_v9 = vld [vmem:[#allocation8 + $0x20] sm:$0xff]   ;;  %v2064_v10 = vld [vmem:[#allocation5 + $0x10] sm:$0xff]   ;;  %v2071_v11 = vld [vmem:[#allocation8 + $0x18] sm:$0xff]   ;;  %p2440_p9 = scmp.lt.s32.totalorder %s1750_s25, %s1750_s25 }
  0x80   :  { %2004 = vmatprep.subr.bf16.mxu0 %v2483_v0  ;;  %2024 = vmatprep.subr.bf16.mxu1 %v2483_v0  ;;  %v2065_v12 = vld [vmem:[#allocation5 + $0x8] sm:$0xff]   ;;  %v2072_v13 = vld [vmem:[#allocation8 + $0x10] sm:$0xff]   ;;  %v2066_v14 = vld [vmem:[#allocation5] sm:$0xff]  }
  0x81   :  { %v2073_v15 = vld [vmem:[#allocation8 + $0x8] sm:$0xff]   ;;  %v180_v16 = vld [vmem:[#allocation2] sm:$0xf]  ;;  %v2074_v17 = vld [vmem:[#allocation8] sm:$0xff]  }
  0x82   :  { %v2075_v18 = vld [vmem:[#allocation13 + $0x78] sm:$0xff]   ;;  %v2079_v21 = vld [vmem:[#allocation13 + $0x70] sm:$0xff]   ;;  %v2083_v23 = vld [vmem:[#allocation13 + $0x68] sm:$0xff]  }
  0x83   :  { %v2076_v19 = vld [vmem:[#allocation13 + $0xf8] sm:$0xff]   ;;  %v2081_v22 = vld [vmem:[#allocation13 + $0x30] sm:$0xff]   ;;  %v2085_v24 = vld [vmem:[#allocation13 + $0x28] sm:$0xff]  }
  0x84   :  { %v2077_v20 = vld [vmem:[#allocation13 + $0x38] sm:$0xff]   ;;  %v2087_v25 = vld [vmem:[#allocation13 + $0x60] sm:$0xff]   ;;  %v2095_v29 = vld [vmem:[#allocation13 + $0x50] sm:$0xff]  }
  0x85   :  { %v2089_v26 = vld [vmem:[#allocation13 + $0x20] sm:$0xff]   ;;  %v2091_v27 = vld [vmem:[#allocation13 + $0x58] sm:$0xff]   ;;  %v2097_v30 = vld [vmem:[#allocation13 + $0x10] sm:$0xff]  }
  0x86   :  { %v2093_v28 = vld [vmem:[#allocation13 + $0x18] sm:$0xff]   ;;  %v2099_v31 = vld [vmem:[#allocation13 + $0x48] sm:$0xff]   ;;  %v2080_v41 = vld [vmem:[#allocation13 + $0xf0] sm:$0xff]  }
  0x87   :  { %2005 = vmatpush3.bf16.xpose.msra.mxu0 %v2060_v2  ;;  %2025 = vmatpush3.bf16.xpose.msra.mxu1 %v2068_v5  ;;  %v2101_v32 = vld [vmem:[#allocation13 + $0x8] sm:$0xff]   ;;  %v1763_v33 = vld [vmem:[#allocation7] ss:$0 sm:$0xff]  ;;  %v2082_v43 = vld [vmem:[#allocation13 + $0xb0] sm:$0xff]  }
  0x88   :  { %2006 = vmatprep.subr.bf16.mxu0 %v2483_v0  ;;  %2026 = vmatprep.subr.bf16.mxu1 %v2483_v0  ;;  %v2078_v39 = vld [vmem:[#allocation13 + $0xb8] sm:$0xff]   ;;  %v2084_v44 = vld [vmem:[#allocation13 + $0xe8] sm:$0xff]   ;;  %v2088_v46 = vld [vmem:[#allocation13 + $0xe0] sm:$0xff]  }
  0x89   :  { %v2086_v45 = vld [vmem:[#allocation13 + $0xa8] sm:$0xff]   ;;  %v2090_v47 = vld [vmem:[#allocation13 + $0xa0] sm:$0xff]   ;;  %v2092_v48 = vld [vmem:[#allocation13 + $0xd8] sm:$0xff]  }
  0x8a   :  { %v2094_v49 = vld [vmem:[#allocation13 + $0x98] sm:$0xff]   ;;  %v2096_v50 = vld [vmem:[#allocation13 + $0xd0] sm:$0xff]   ;;  %v2100_v52 = vld [vmem:[#allocation13 + $0xc8] sm:$0xff]  }
  0x8b   :  { %v2098_v51 = vld [vmem:[#allocation13 + $0x90] sm:$0xff]   ;;  %v2102_v53 = vld [vmem:[#allocation13 + $0x88] sm:$0xff]   ;;  %v2103_v54 = vld [vmem:[#allocation13 + $0x40] sm:$0xff]  }
  0x8c   :  { %v2104_v55 = vld [vmem:[#allocation13 + $0xc0] sm:$0xff]   ;;  %v2107_v58 = vld [vmem:[#allocation11 + $0x78] sm:$0xff]  }
  0x8d   :  { %v2105_v56 = vld [vmem:[#allocation13] sm:$0xff]   ;;  %v2108_v59 = vld [vmem:[#allocation11 + $0xf8] sm:$0xff]  }
  0x8e   :  { %v2106_v57 = vld [vmem:[#allocation13 + $0x80] sm:$0xff]   ;;  %v1772_v60 = vld [vmem:[#allocation10] ss:$0 sm:$0xff] }
  0x8f   :  { %2007 = vmatpush3.bf16.xpose.msra.mxu0 %v2061_v4  ;;  %2027 = vmatpush3.bf16.xpose.msra.mxu1 %v2069_v7  ;;  %v1781_v63 = vld [vmem:[#allocation14] ss:$0 sm:$0xff]  ;;  %v2110_v7 = vld [vmem:[#allocation11 + $0xb8] sm:$0xff]  }
  0x90   :  { %2008 = vmatprep.subr.bf16.mxu0 %v2483_v0  ;;  %2028 = vmatprep.subr.bf16.mxu1 %v2483_v0 }
  0x97   :  { %2009 = vmatpush3.bf16.xpose.msra.mxu0 %v2062_v6  ;;  %2029 = vmatpush3.bf16.xpose.msra.mxu1 %v2070_v9  ;;  %v2109_v6 = vld [vmem:[#allocation11 + $0x38] sm:$0xff]   ;;  %v2112_v9 = vld [vmem:[#allocation11 + $0xf0] sm:$0xff]  }
  0x98   :  { %2010 = vmatprep.subr.bf16.mxu0 %v2483_v0  ;;  %2030 = vmatprep.subr.bf16.mxu1 %v2483_v0 }
  0x9f   :  { %2011 = vmatpush3.bf16.xpose.msra.mxu0 %v2063_v8  ;;  %2031 = vmatpush3.bf16.xpose.msra.mxu1 %v2071_v11  ;;  %v2111_v8 = vld [vmem:[#allocation11 + $0x70] sm:$0xff]  }
  0xa0   :  { %2012 = vmatprep.subr.bf16.mxu0 %v2483_v0  ;;  %2032 = vmatprep.subr.bf16.mxu1 %v2483_v0  ;;  %v2113_v11 = vld [vmem:[#allocation11 + $0x30] sm:$0xff]  }
  0xa7   :  { %2013 = vmatpush3.bf16.xpose.msra.mxu0 %v2064_v10  ;;  %2033 = vmatpush3.bf16.xpose.msra.mxu1 %v2072_v13  ;;  %v2115_v13 = vld [vmem:[#allocation11 + $0x68] sm:$0xff]  }
  0xa8   :  { %2014 = vmatprep.subr.bf16.mxu0 %v2483_v0  ;;  %2034 = vmatprep.subr.bf16.mxu1 %v2483_v0 }
  0xaf   :  { %2015 = vmatpush3.bf16.xpose.msra.mxu0 %v2065_v12  ;;  %2035 = vmatpush3.bf16.xpose.msra.mxu1 %v2073_v15  ;;  %v2114_v12 = vld [vmem:[#allocation11 + $0xb0] sm:$0xff]   ;;  %v2117_v15 = vld [vmem:[#allocation11 + $0x28] sm:$0xff]  }
  0xb0   :  { %2016 = vmatprep.subr.bf16.mxu0 %v2483_v0  ;;  %2036 = vmatprep.subr.bf16.mxu1 %v2483_v0 }
  0xb7   :  { %2017 = vmatpush3.bf16.xpose.msra.mxu0 %v2066_v14  ;;  %2037 = vmatpush3.bf16.xpose.msra.mxu1 %v2074_v17  ;;  %v2116_v14 = vld [vmem:[#allocation11 + $0xe8] sm:$0xff]   ;;  %v2119_v17 = vld [vmem:[#allocation11 + $0x60] sm:$0xff]  }
  0xb8   :  { %1930 = vmatprep.subr.bf16.mxu0 %v2075_v18  ;;  %1948 = vmatprep.subr.bf16.mxu1 %v2076_v19  ;;  %v2120_v18 = vld [vmem:[#allocation11 + $0xe0] sm:$0xff]  }
  0xb9   :  { %v2121_v19 = vld [vmem:[#allocation11 + $0x20] sm:$0xff]  }
  0xbe   :  { %2019 = vmatmul.mubr.bf16.vlgmr.msra.gmra.mxu0 %v180_v16  ;;  %v2118_v16 = vld [vmem:[#allocation11 + $0xa8] sm:$0xff]  }
  0xbf   :  { %1931 = vmatpush3.bf16.xpose.msra.mxu0 %v2077_v20  ;;  %v2122_v20 = vld [vmem:[#allocation11 + $0xa0] sm:$0xff]  }
  0xc0   :  { %1932 = vmatprep.subr.bf16.mxu0 %v2079_v21  ;;  %v2123_v21 = vld [vmem:[#allocation11 + $0x58] sm:$0xff]  }
  0xc7   :  { %1933 = vmatpush3.bf16.xpose.msra.mxu0 %v2081_v22  ;;  %v2124_v22 = vld [vmem:[#allocation11 + $0xd8] sm:$0xff]  }
  0xc8   :  { %1934 = vmatprep.subr.bf16.mxu0 %v2083_v23  ;;  %v2125_v23 = vld [vmem:[#allocation11 + $0x18] sm:$0xff]  }
  0xcf   :  { %1935 = vmatpush3.bf16.xpose.msra.mxu0 %v2085_v24  ;;  %v2126_v24 = vld [vmem:[#allocation11 + $0x98] sm:$0xff]  }
  0xd0   :  { %1936 = vmatprep.subr.bf16.mxu0 %v2087_v25  ;;  %v2127_v25 = vld [vmem:[#allocation11 + $0x50] sm:$0xff]  }
  0xd7   :  { %1937 = vmatpush3.bf16.xpose.msra.mxu0 %v2089_v26  ;;  %v2128_v26 = vld [vmem:[#allocation11 + $0xd0] sm:$0xff]  }
  0xd8   :  { %1938 = vmatprep.subr.bf16.mxu0 %v2091_v27  ;;  %v2129_v27 = vld [vmem:[#allocation11 + $0x10] sm:$0xff]  }
  0xdf   :  { %1939 = vmatpush3.bf16.xpose.msra.mxu0 %v2093_v28  ;;  %v2130_v28 = vld [vmem:[#allocation11 + $0x90] sm:$0xff]  }
  0xe0   :  { %1940 = vmatprep.subr.bf16.mxu0 %v2095_v29  ;;  %v2131_v29 = vld [vmem:[#allocation11 + $0x48] sm:$0xff]  }
  0xe7   :  { %1941 = vmatpush3.bf16.xpose.msra.mxu0 %v2097_v30  ;;  %v2132_v30 = vld [vmem:[#allocation11 + $0xc8] sm:$0xff]  }
  0xe8   :  { %1942 = vmatprep.subr.bf16.mxu0 %v2099_v31  ;;  %v2133_v31 = vld [vmem:[#allocation11 + $0x8] sm:$0xff]  }
  0xef   :  { %1943 = vmatpush3.bf16.xpose.msra.mxu0 %v2101_v32  ;;  %v2134_v32 = vld [vmem:[#allocation11 + $0x88] sm:$0xff]  }
  0xf0   :  { %1944 = vmatprep.subr.bf16.mxu0 %v2103_v54  ;;  %v2168_v54 = vld [vmem:[#allocation17 + $0x6c] ss:$16 sps:$4 sm:$0xff]  }
  0xf7   :  { %1945 = vmatpush3.bf16.xpose.msra.mxu0 %v2105_v56  ;;  %v2166_v56 = vld [vmem:[#allocation17 + $0x68] ss:$16 sps:$4 sm:$0xff]  }
  0xf8   :  { %1966 = vmatprep.subr.bf16.mxu0 %v2107_v58  ;;  %v2174_v58 = vld [vmem:[#allocation17 + $0x4c] ss:$16 sps:$4 sm:$0xff]  }
 0x17e   :  { %v286_v34 = vpop.f32.mrf.mxu0 }
 0x17f   :  { %v287_v35 = vadd.f32 %v1763_v33, %v286_v34  ;;  %v2135_v33 = vld [vmem:[#allocation11 + $0x40] sm:$0xff]  }
 0x180   :  { %v2020_v36 = vpop.f32.mrf.mxu0  ;;  %v2136_v34 = vld [vmem:[#allocation11 + $0xc0] sm:$0xff]  }
 0x181   :  { %v292_v37 = vmax.f32 %v287_v35, 0.0  ;;  %v2137_v35 = vld [vmem:[#allocation11] sm:$0xff]  }
 0x182   :  { %v289_v38 = vpop.f32.mrf.mxu0  ;;  %v2138_v36 = vld [vmem:[#allocation11 + $0x80] sm:$0xff]  }
 0x183   :  { %v293_v40 = vpack.c.bf16 %v292_v37, %v292_v37  ;;  %v2139_v37 = vld [vmem:[#allocation17 + $0xe0] ss:$16 sps:$4 sm:$0xff]   ;;  %v2141_v38 = vld [vmem:[#allocation17 + $0xe4] ss:$16 sps:$4 sm:$0xff]  }
 0x184   :  { %v2021_v42 = vpop.f32.mrf.mxu0 }
 0x185   :  { %2039 = vmatmul.mubr.bf16.vlgmr.msra.gmra.mxu1 %v293_v40  ;;  %v2144_v40 = vld [vmem:[#allocation17 + $0xec] ss:$16 sps:$4 sm:$0xff]  }
 0x186   :  { %1949 = vmatpush3.bf16.xpose.msra.mxu1 %v2078_v39  ;;  %v2142_v39 = vld [vmem:[#allocation17 + $0xe8] ss:$16 sps:$4 sm:$0xff]   ;;  %v2150_v42 = vld [vmem:[#allocation17 + $0xcc] ss:$16 sps:$4 sm:$0xff]  }
 0x187   :  { %1950 = vmatprep.subr.bf16.mxu1 %v2080_v41  ;;  %v2147_v41 = vld [vmem:[#allocation17 + $0xc4] ss:$16 sps:$4 sm:$0xff]  }
 0x18e   :  { %1951 = vmatpush3.bf16.xpose.msra.mxu1 %v2082_v43  ;;  %v2145_v43 = vld [vmem:[#allocation17 + $0xc0] ss:$16 sps:$4 sm:$0xff]  }
 0x18f   :  { %1952 = vmatprep.subr.bf16.mxu1 %v2084_v44  ;;  %v2148_v44 = vld [vmem:[#allocation17 + $0xc8] ss:$16 sps:$4 sm:$0xff]  }
 0x196   :  { %1953 = vmatpush3.bf16.xpose.msra.mxu1 %v2086_v45  ;;  %v2153_v45 = vld [vmem:[#allocation17 + $0xa4] ss:$16 sps:$4 sm:$0xff]  }
 0x197   :  { %1954 = vmatprep.subr.bf16.mxu1 %v2088_v46  ;;  %v2156_v46 = vld [vmem:[#allocation17 + $0xac] ss:$16 sps:$4 sm:$0xff]  }
 0x19e   :  { %1955 = vmatpush3.bf16.xpose.msra.mxu1 %v2090_v47  ;;  %v2151_v47 = vld [vmem:[#allocation17 + $0xa0] ss:$16 sps:$4 sm:$0xff]  }
 0x19f   :  { %1956 = vmatprep.subr.bf16.mxu1 %v2092_v48  ;;  %v2154_v48 = vld [vmem:[#allocation17 + $0xa8] ss:$16 sps:$4 sm:$0xff]  }
 0x1a6   :  { %1957 = vmatpush3.bf16.xpose.msra.mxu1 %v2094_v49  ;;  %v2159_v49 = vld [vmem:[#allocation17 + $0x84] ss:$16 sps:$4 sm:$0xff]  }
 0x1a7   :  { %1958 = vmatprep.subr.bf16.mxu1 %v2096_v50  ;;  %v2162_v50 = vld [vmem:[#allocation17 + $0x8c] ss:$16 sps:$4 sm:$0xff]  }
 0x1ae   :  { %1959 = vmatpush3.bf16.xpose.msra.mxu1 %v2098_v51  ;;  %v2157_v51 = vld [vmem:[#allocation17 + $0x80] ss:$16 sps:$4 sm:$0xff]  }
 0x1af   :  { %1960 = vmatprep.subr.bf16.mxu1 %v2100_v52  ;;  %v2160_v52 = vld [vmem:[#allocation17 + $0x88] ss:$16 sps:$4 sm:$0xff]  }
 0x1b6   :  { %1961 = vmatpush3.bf16.xpose.msra.mxu1 %v2102_v53  ;;  %v2165_v53 = vld [vmem:[#allocation17 + $0x64] ss:$16 sps:$4 sm:$0xff]  }
 0x1b7   :  { %1962 = vmatprep.subr.bf16.mxu1 %v2104_v55  ;;  %v2163_v55 = vld [vmem:[#allocation17 + $0x60] ss:$16 sps:$4 sm:$0xff]  }
 0x1be   :  { %1963 = vmatpush3.bf16.xpose.msra.mxu1 %v2106_v57  ;;  %v2171_v57 = vld [vmem:[#allocation17 + $0x44] ss:$16 sps:$4 sm:$0xff]  }
 0x1bf   :  { %1984 = vmatprep.subr.bf16.mxu1 %v2108_v59  ;;  %v2169_v59 = vld [vmem:[#allocation17 + $0x40] ss:$16 sps:$4 sm:$0xff]  }
 0x245   :  { %v399_v61 = vpop.f32.mrf.mxu1 }
 0x246   :  { %v400_v62 = vadd.f32 %v1772_v60, %v399_v61  ;;  %v2172_v60 = vld [vmem:[#allocation17 + $0x48] ss:$16 sps:$4 sm:$0xff]   ;;  %v2177_v61 = vld [vmem:[#allocation17 + $0x24] ss:$16 sps:$4 sm:$0xff]  }
 0x247   :  { %v2040_v0 = vpop.f32.mrf.mxu1 }
 0x248   :  { %v405_v1 = vmax.f32 %v400_v62, 0.0  ;;  %v2180_v62 = vld [vmem:[#allocation17 + $0x2c] ss:$16 sps:$4 sm:$0xff]   ;;  %v2178_v0 = vld [vmem:[#allocation17 + $0x28] ss:$16 sps:$4 sm:$0xff]  }
 0x249   :  { %v402_v2 = vpop.f32.mrf.mxu1 }
 0x24a   :  { %v478_v3 = vmul.f32 %v1781_v63, %v405_v1  ;;  %v406_v10 = vpack.c.bf16 %v405_v1, %v405_v1  ;;  %v2175_v63 = vld [vmem:[#allocation17 + $0x20] ss:$16 sps:$4 sm:$0xff]   ;;  %v2183_v1 = vld [vmem:[#allocation17 + $0x4] ss:$16 sps:$4 sm:$0xff]   ;;  %v2186_v2 = vld [vmem:[#allocation17 + $0xc] ss:$16 sps:$4 sm:$0xff]  }
 0x24b   :  { %v2041_v4 = vpop.f32.mrf.mxu1 }
 0x24c   :  { %v479_v5 = vpack.c.bf16 %v478_v3, %v478_v3  ;;  %v2181_v3 = vld [vmem:[#allocation17] ss:$16 sps:$4 sm:$0xff]   ;;  %v2184_v4 = vld [vmem:[#allocation17 + $0x8] ss:$16 sps:$4 sm:$0xff]  }
 0x24e   :  { %1946 = vmatprep.mubr.bf16.mxu0 %v479_v5  ;;  %1964 = vmatprep.mubr.bf16.mxu1 %v479_v5 }
 0x24f   :  { %1947 = vmatmul.mubr.bf16.vlgmr.msra.gmra.mxu0 %v479_v5  ;;  %1965 = vmatmul.mubr.bf16.vlgmr.msra.gmra.mxu1 %v479_v5  ;;  %v2189_v5 = vld [vmem:[#allocation16 + $0xe4] ss:$16 sps:$4 sm:$0xff]  }
 0x250   :  { %1967 = vmatpush3.bf16.xpose.msra.mxu0 %v2109_v6  ;;  %1985 = vmatpush3.bf16.xpose.msra.mxu1 %v2110_v7  ;;  %v2192_v6 = vld [vmem:[#allocation16 + $0xec] ss:$16 sps:$4 sm:$0xff]  }
 0x251   :  { %1982 = vmatprep.mubr.bf16.mxu0 %v406_v10  ;;  %2000 = vmatprep.mubr.bf16.mxu1 %v406_v10 }
 0x252   :  { %1968 = vmatprep.subr.bf16.mxu0 %v2111_v8  ;;  %1986 = vmatprep.subr.bf16.mxu1 %v2112_v9 }
 0x258   :  { %1969 = vmatpush3.bf16.xpose.msra.mxu0 %v2113_v11  ;;  %1987 = vmatpush3.bf16.xpose.msra.mxu1 %v2114_v12 }
 0x259   :  { %1970 = vmatprep.subr.bf16.mxu0 %v2115_v13  ;;  %1988 = vmatprep.subr.bf16.mxu1 %v2116_v14 }
 0x260   :  { %1971 = vmatpush3.bf16.xpose.msra.mxu0 %v2117_v15  ;;  %1989 = vmatpush3.bf16.xpose.msra.mxu1 %v2118_v16  ;;  %v820_v15 = vlaneseq }
 0x261   :  { %1972 = vmatprep.subr.bf16.mxu0 %v2119_v17  ;;  %1990 = vmatprep.subr.bf16.mxu1 %v2120_v18 }
 0x262   :  { %v821_v16 = vshrl.u32 %v820_v15, 7  ;;  %v2202_v15 = vld [vmem:[#allocation16 + $0xa8] ss:$16 sps:$4 sm:$0xff]  }
 0x264   :  { %v822_v17 = vsub.s32 0, %v821_v16  ;;  %v830_v18 = vsub.s32 2, %v821_v16 }
 0x268   :  { %1973 = vmatpush3.bf16.xpose.msra.mxu0 %v2121_v19  ;;  %1991 = vmatpush3.bf16.xpose.msra.mxu1 %v2122_v20  ;;  %v818_v19 = vld [vmem:[%s2644_s8] sm:$0xf]  ;;  %v826_v20 = vsub.s32 1, %v821_v16 }
 0x269   :  { %1974 = vmatprep.subr.bf16.mxu0 %v2123_v21  ;;  %1992 = vmatprep.subr.bf16.mxu1 %v2124_v22  ;;  %v834_v21 = vsub.s32 3, %v821_v16  ;;  %v823_v22 = vrot.slane %v818_v19, %v822_v17  ;;  %v2207_v16 = vld [vmem:[#allocation16 + $0x84] ss:$16 sps:$4 sm:$0xff]  }
 0x270   :  { %1975 = vmatpush3.bf16.xpose.msra.mxu0 %v2125_v23  ;;  %1993 = vmatpush3.bf16.xpose.msra.mxu1 %v2126_v24  ;;  %v831_v23 = vrot.slane %v818_v19, %v830_v18  ;;  %v1118_v24 = vld [vmem:[%s2645_s9] sm:$0xf] }
 0x271   :  { %1976 = vmatprep.subr.bf16.mxu0 %v2127_v25  ;;  %1994 = vmatprep.subr.bf16.mxu1 %v2128_v26  ;;  %v827_v25 = vrot.slane %v818_v19, %v826_v20  ;;  %v835_v26 = vrot.slane %v818_v19, %v834_v21  ;;  %v2208_v19 = vld [vmem:[#allocation16 + $0x88] ss:$16 sps:$4 sm:$0xff]  }
 0x278   :  { %1977 = vmatpush3.bf16.xpose.msra.mxu0 %v2129_v27  ;;  %1995 = vmatpush3.bf16.xpose.msra.mxu1 %v2130_v28 }
 0x279   :  { %1978 = vmatprep.subr.bf16.mxu0 %v2131_v29  ;;  %1996 = vmatprep.subr.bf16.mxu1 %v2132_v30  ;;  %v1123_v29 = vrot.slane %v1118_v24, %v822_v17  ;;  %v1131_v30 = vrot.slane %v1118_v24, %v830_v18 }
 0x280   :  { %1979 = vmatpush3.bf16.xpose.msra.mxu0 %v2133_v31  ;;  %1997 = vmatpush3.bf16.xpose.msra.mxu1 %v2134_v32 }
 0x281   :  { %1980 = vmatprep.subr.bf16.mxu0 %v2135_v33  ;;  %1998 = vmatprep.subr.bf16.mxu1 %v2136_v34  ;;  %v1127_v33 = vrot.slane %v1118_v24, %v826_v20  ;;  %v1135_v34 = vrot.slane %v1118_v24, %v834_v21  ;;  %v2219_v24 = vld [vmem:[#allocation16 + $0x44] ss:$16 sps:$4 sm:$0xff]  }
 0x288   :  { %1981 = vmatpush3.bf16.xpose.msra.mxu0 %v2137_v35  ;;  %1999 = vmatpush3.bf16.xpose.msra.mxu1 %v2138_v36 }
 0x289   :  { %1406 = vmatprep.subr.bf16.mxu0 %v2141_v38  ;;  %1446 = vmatprep.subr.bf16.mxu1 %v2144_v40  ;;  %v1184_v38 = vld [vmem:[%s2648_s12] sm:$0xf] }
 0x28f   :  { %1983 = vmatmul.mubr.bf16.vlgmr.msra.gmra.mxu0 %v406_v10  ;;  %2001 = vmatmul.mubr.bf16.vlgmr.msra.gmra.mxu1 %v406_v10 }
 0x290   :  { %1407 = vmatpush1.bf16.xpose.msra.mxu0 %v2139_v37  ;;  %1447 = vmatpush1.bf16.xpose.msra.mxu1 %v2142_v39 }
 0x291   :  { %1408 = vmatprep.subr.bf16.mxu0 %v2147_v41  ;;  %1448 = vmatprep.subr.bf16.mxu1 %v2150_v42 }
 0x298   :  { %1409 = vmatpush1.bf16.xpose.msra.mxu0 %v2145_v43  ;;  %1449 = vmatpush1.bf16.xpose.msra.mxu1 %v2148_v44 }
 0x299   :  { %1410 = vmatprep.subr.bf16.mxu0 %v2153_v45  ;;  %1450 = vmatprep.subr.bf16.mxu1 %v2156_v46  ;;  %v1189_v46 = vrot.slane %v1184_v38, %v822_v17  ;;  %v2210_v17 = vld [vmem:[#allocation16 + $0x8c] ss:$16 sps:$4 sm:$0xff]  }
 0x2a0   :  { %1411 = vmatpush1.bf16.xpose.msra.mxu0 %v2151_v47  ;;  %1451 = vmatpush1.bf16.xpose.msra.mxu1 %v2154_v48  ;;  %v1197_v47 = vrot.slane %v1184_v38, %v830_v18  ;;  %v2205_v18 = vld [vmem:[#allocation16 + $0x80] ss:$16 sps:$4 sm:$0xff]  }
 0x2a1   :  { %1412 = vmatprep.subr.bf16.mxu0 %v2159_v49  ;;  %1452 = vmatprep.subr.bf16.mxu1 %v2162_v50 }
 0x2a8   :  { %1413 = vmatpush1.bf16.xpose.msra.mxu0 %v2157_v51  ;;  %1453 = vmatpush1.bf16.xpose.msra.mxu1 %v2160_v52 }
 0x2a9   :  { %1414 = vmatprep.subr.bf16.mxu0 %v2165_v53  ;;  %1454 = vmatprep.subr.bf16.mxu1 %v2168_v54 }
 0x2b0   :  { %1415 = vmatpush1.bf16.xpose.msra.mxu0 %v2163_v55  ;;  %1455 = vmatpush1.bf16.xpose.msra.mxu1 %v2166_v56  ;;  %v1193_v56 = vrot.slane %v1184_v38, %v826_v20  ;;  %v2213_v20 = vld [vmem:[#allocation16 + $0x64] ss:$16 sps:$4 sm:$0xff]  }
 0x2b1   :  { %1416 = vmatprep.subr.bf16.mxu0 %v2171_v57  ;;  %1456 = vmatprep.subr.bf16.mxu1 %v2174_v58  ;;  %v1201_v57 = vrot.slane %v1184_v38, %v834_v21  ;;  %v2216_v21 = vld [vmem:[#allocation16 + $0x6c] ss:$16 sps:$4 sm:$0xff]  }
 0x2b8   :  { %1417 = vmatpush1.bf16.xpose.msra.mxu0 %v2169_v59  ;;  %1457 = vmatpush1.bf16.xpose.msra.mxu1 %v2172_v60 }
 0x2b9   :  { %1418 = vmatprep.subr.bf16.mxu0 %v2177_v61  ;;  %1458 = vmatprep.subr.bf16.mxu1 %v2180_v62 }
 0x2c0   :  { %1419 = vmatpush1.bf16.xpose.msra.mxu0 %v2175_v63  ;;  %1459 = vmatpush1.bf16.xpose.msra.mxu1 %v2178_v0 }
 0x2c1   :  { %1420 = vmatprep.subr.bf16.mxu0 %v2183_v1  ;;  %1460 = vmatprep.subr.bf16.mxu1 %v2186_v2  ;;  %v2187_v2 = vld [vmem:[#allocation16 + $0xe0] ss:$16 sps:$4 sm:$0xff]  }
 0x2c8   :  { %1421 = vmatpush1.bf16.xpose.msra.mxu0 %v2181_v3  ;;  %1461 = vmatpush1.bf16.xpose.msra.mxu1 %v2184_v4  ;;  %v2190_v3 = vld [vmem:[#allocation16 + $0xe8] ss:$16 sps:$4 sm:$0xff]  }
 0x2c9   :  { %1654 = vmatprep.subr.bf16.mxu0 %v2189_v5  ;;  %1694 = vmatprep.subr.bf16.mxu1 %v2192_v6  ;;  %v2195_v6 = vld [vmem:[#allocation16 + $0xc4] ss:$16 sps:$4 sm:$0xff]  }
 0x30f   :  { %v770_v7 = vpop.f32.mrf.mxu0  ;;  %v811_v8 = vpop.f32.mrf.mxu1 }
 0x310   :  { %v840_v27 = vmul.f32 %v823_v22, %v770_v7  ;;  %v842_v28 = vmul.f32 %v831_v23, %v811_v8  ;;  %v2198_v7 = vld [vmem:[#allocation16 + $0xcc] ss:$16 sps:$4 sm:$0xff]   ;;  %v2211_v22 = vld [vmem:[#allocation16 + $0x60] ss:$16 sps:$4 sm:$0xff]   ;;  %v2214_v23 = vld [vmem:[#allocation16 + $0x68] ss:$16 sps:$4 sm:$0xff]  }
 0x311   :  { %v772_v9 = vpop.f32.mrf.mxu0  ;;  %v813_v10 = vpop.f32.mrf.mxu1 }
 0x312   :  { %v841_v35 = vmul.f32 %v827_v25, %v772_v9  ;;  %v843_v36 = vmul.f32 %v835_v26, %v813_v10  ;;  %v2193_v10 = vld [vmem:[#allocation16 + $0xc0] ss:$16 sps:$4 sm:$0xff]   ;;  %v2222_v25 = vld [vmem:[#allocation16 + $0x4c] ss:$16 sps:$4 sm:$0xff]  }
 0x313   :  { %v774_v11 = vpop.f32.mrf.mxu0  ;;  %v815_v12 = vpop.f32.mrf.mxu1  ;;  %v2217_v26 = vld [vmem:[#allocation16 + $0x40] ss:$16 sps:$4 sm:$0xff]  }
 0x314   :  { %v2196_v11 = vld [vmem:[#allocation16 + $0xc8] ss:$16 sps:$4 sm:$0xff]   ;;  %v2201_v12 = vld [vmem:[#allocation16 + $0xa4] ss:$16 sps:$4 sm:$0xff]  }
 0x315   :  { %v775_v13 = vpop.f32.mrf.mxu0  ;;  %v816_v14 = vpop.f32.mrf.mxu1 }
 0x316   :  { %v2204_v13 = vld [vmem:[#allocation16 + $0xac] ss:$16 sps:$4 sm:$0xff]   ;;  %v2199_v14 = vld [vmem:[#allocation16 + $0xa0] ss:$16 sps:$4 sm:$0xff]  }
 0x34f   :  { %v1070_v31 = vpop.f32.mrf.mxu0  ;;  %v1111_v32 = vpop.f32.mrf.mxu1 }
 0x350   :  { %v1071_v37 = vadd.f32 %v1070_v31, %v840_v27  ;;  %v1112_v39 = vadd.f32 %v1111_v32, %v842_v28  ;;  %v2220_v27 = vld [vmem:[#allocation16 + $0x48] ss:$16 sps:$4 sm:$0xff]   ;;  %v2225_v28 = vld [vmem:[#allocation16 + $0x24] ss:$16 sps:$4 sm:$0xff]  }
 0x351   :  { %v1072_v40 = vpop.f32.mrf.mxu0  ;;  %v1113_v41 = vpop.f32.mrf.mxu1  ;;  %v2226_v31 = vld [vmem:[#allocation16 + $0x28] ss:$16 sps:$4 sm:$0xff]   ;;  %v2231_v32 = vld [vmem:[#allocation16 + $0x4] ss:$16 sps:$4 sm:$0xff]  }
 0x352   :  { %v1140_v42 = vadd.f32 %v1123_v29, %v1071_v37  ;;  %v1142_v43 = vadd.f32 %v1131_v30, %v1112_v39  ;;  %v1073_v44 = vadd.f32 %v1072_v40, %v841_v35  ;;  %v1114_v45 = vadd.f32 %v1113_v41, %v843_v36  ;;  %v2228_v29 = vld [vmem:[#allocation16 + $0x2c] ss:$16 sps:$4 sm:$0xff]   ;;  %v2223_v30 = vld [vmem:[#allocation16 + $0x20] ss:$16 sps:$4 sm:$0xff]   ;;  %v2232_v35 = vld [vmem:[#allocation16 + $0x8] ss:$16 sps:$4 sm:$0xff]  }
 0x353   :  { %v1074_v48 = vpop.f32.mrf.mxu0  ;;  %v1115_v49 = vpop.f32.mrf.mxu1 }
 0x354   :  { %v2617_v50 = vmax.f32 %v1140_v42, 0.0  ;;  %v2619_v51 = vmax.f32 %v1142_v43, 0.0  ;;  %v1141_v52 = vadd.f32 %v1127_v33, %v1073_v44  ;;  %v1143_v53 = vadd.f32 %v1135_v34, %v1114_v45  ;;  %v2234_v33 = vld [vmem:[#allocation16 + $0xc] ss:$16 sps:$4 sm:$0xff]   ;;  %v2229_v34 = vld [vmem:[#allocation16] ss:$16 sps:$4 sm:$0xff]  }
 0x355   :  { %v1075_v54 = vpop.f32.mrf.mxu0  ;;  %v1116_v55 = vpop.f32.mrf.mxu1 }
 0x356   :  { %v1145_v58 = vmax.f32 %v1141_v52, 0.0  ;;  %v1147_v59 = vmax.f32 %v1143_v53, 0.0  ;;  %v1206_v60 = vmul.f32 %v1189_v46, %v2617_v50  ;;  %v1208_v61 = vmul.f32 %v1197_v47, %v2619_v51  ;;  %v1878_v47 = vld [vmem:[%s2649_s13] ss:$0 sm:$0xff]  ;;  %s2435_s13 = scalar_lea.vmem %s1750_s25, 128 }
 0x357   :  { %v1148_v36 = vpack.c.bf16 %v2617_v50, %v2617_v50  ;;  %v1150_v37 = vpack.c.bf16 %v2619_v51, %v2619_v51  ;;  %v1911_v51 = vld [vmem:[%s2650_s14] ss:$0 sm:$0xff]  ;;  %p2436_p8 = scmp.ne.s32.totalorder %s1750_s25, %s2435_s13  ;;  %p2441_p10 = scmp.lt.s32.totalorder %s2435_s13, %s2435_s13 }
 0x358   :  { %v1207_v62 = vmul.f32 %v1193_v56, %v1145_v58  ;;  %v1209_v63 = vmul.f32 %v1201_v57, %v1147_v59  ;;  %v1210_v4 = vpack.c.bf16 %v1206_v60, %v1206_v60  ;;  %v1212_v5 = vpack.c.bf16 %v1208_v61, %v1208_v61 }
 0x359   :  { %v1149_v8 = vpack.c.bf16 %v1145_v58, %v1145_v58  ;;  %v1151_v9 = vpack.c.bf16 %v1147_v59, %v1147_v59  ;;  %p2442_p11 = por %p2441_p10, %p2440_p9 }
 0x35a   :  { %v1211_v0 = vpack.c.bf16 %v1207_v62, %v1207_v62  ;;  %v1213_v1 = vpack.c.bf16 %v1209_v63, %v1209_v63 }
 0x35b   :  { %p2443_p12 = pnand %p2442_p11, %p2436_p8 }
 0x35c   :  { %1438 = vmatprep.mubr.bf16.mxu0 %v1211_v0  ;;  %1478 = vmatprep.mubr.bf16.mxu1 %v1213_v1 }
 0x35d   :  { %1439 = vmatmul.mubr.bf16.vlgmr.msra.gmra.mxu0 %v1210_v4  ;;  %1479 = vmatmul.mubr.bf16.vlgmr.msra.gmra.mxu1 %v1212_v5 }
 0x35e   :  { %1655 = vmatpush1.bf16.xpose.msra.mxu0 %v2187_v2  ;;  %1695 = vmatpush1.bf16.xpose.msra.mxu1 %v2190_v3 }
 0x35f   :  { %1686 = vmatprep.mubr.bf16.mxu0 %v1149_v8  ;;  %1726 = vmatprep.mubr.bf16.mxu1 %v1151_v9 }
 0x360   :  { %1656 = vmatprep.subr.bf16.mxu0 %v2195_v6  ;;  %1696 = vmatprep.subr.bf16.mxu1 %v2198_v7 }
 0x366   :  { %1657 = vmatpush1.bf16.xpose.msra.mxu0 %v2193_v10  ;;  %1697 = vmatpush1.bf16.xpose.msra.mxu1 %v2196_v11 }
 0x367   :  { %1658 = vmatprep.subr.bf16.mxu0 %v2201_v12  ;;  %1698 = vmatprep.subr.bf16.mxu1 %v2204_v13 }
 0x36e   :  { %1659 = vmatpush1.bf16.xpose.msra.mxu0 %v2199_v14  ;;  %1699 = vmatpush1.bf16.xpose.msra.mxu1 %v2202_v15 }
 0x36f   :  { %1660 = vmatprep.subr.bf16.mxu0 %v2207_v16  ;;  %1700 = vmatprep.subr.bf16.mxu1 %v2210_v17 }
 0x376   :  { %1661 = vmatpush1.bf16.xpose.msra.mxu0 %v2205_v18  ;;  %1701 = vmatpush1.bf16.xpose.msra.mxu1 %v2208_v19 }
 0x377   :  { %1662 = vmatprep.subr.bf16.mxu0 %v2213_v20  ;;  %1702 = vmatprep.subr.bf16.mxu1 %v2216_v21 }
 0x37e   :  { %1663 = vmatpush1.bf16.xpose.msra.mxu0 %v2211_v22  ;;  %1703 = vmatpush1.bf16.xpose.msra.mxu1 %v2214_v23 }
 0x37f   :  { %1664 = vmatprep.subr.bf16.mxu0 %v2219_v24  ;;  %1704 = vmatprep.subr.bf16.mxu1 %v2222_v25 }
 0x386   :  { %1665 = vmatpush1.bf16.xpose.msra.mxu0 %v2217_v26  ;;  %1705 = vmatpush1.bf16.xpose.msra.mxu1 %v2220_v27 }
 0x387   :  { %1666 = vmatprep.subr.bf16.mxu0 %v2225_v28  ;;  %1706 = vmatprep.subr.bf16.mxu1 %v2228_v29 }
 0x38e   :  { %1667 = vmatpush1.bf16.xpose.msra.mxu0 %v2223_v30  ;;  %1707 = vmatpush1.bf16.xpose.msra.mxu1 %v2226_v31 }
 0x38f   :  { %1668 = vmatprep.subr.bf16.mxu0 %v2231_v32  ;;  %1708 = vmatprep.subr.bf16.mxu1 %v2234_v33 }
 0x396   :  { %1669 = vmatpush1.bf16.xpose.msra.mxu0 %v2229_v34  ;;  %1709 = vmatpush1.bf16.xpose.msra.mxu1 %v2232_v35 }
 0x39d   :  { %1687 = vmatmul.mubr.bf16.vlgmr.msra.gmra.mxu0 %v1148_v36  ;;  %1727 = vmatmul.mubr.bf16.vlgmr.msra.gmra.mxu1 %v1150_v37 }
 0x41d   :  { %v1440_v38 = vpop.f32.mrf.mxu0  ;;  %v1480_v39 = vpop.f32.mrf.mxu1 }
 0x41e   :  { %v1481_v46 = vadd.f32 %v1480_v39, %v1440_v38 }
 0x41f   :  { %v1442_v40 = vpop.f32.mrf.mxu0  ;;  %v1482_v41 = vpop.f32.mrf.mxu1 }
 0x420   :  { %v1493_v48 = vmul.f32 %v1878_v47, %v1481_v46 }
 0x421   :  { %v1443_v42 = vpop.f32.mrf.mxu0  ;;  %v1483_v43 = vpop.f32.mrf.mxu1 }
 0x423   :  { %v1444_v44 = vpop.f32.mrf.mxu0  ;;  %v1484_v45 = vpop.f32.mrf.mxu1 }
 0x45d   :  { %v1688_v49 = vpop.f32.mrf.mxu0  ;;  %v1728_v50 = vpop.f32.mrf.mxu1 }
 0x45e   :  { %v1689_v52 = vadd.f32 %v1688_v49, %v1493_v48 }
 0x45f   :  { %v1690_v53 = vpop.f32.mrf.mxu0  ;;  %v1730_v54 = vpop.f32.mrf.mxu1 }
 0x460   :  { %v1729_v55 = vadd.f32 %v1728_v50, %v1689_v52 }
 0x461   :  { %v1691_v56 = vpop.f32.mrf.mxu0  ;;  %v1731_v57 = vpop.f32.mrf.mxu1 }
 0x462   :  { %v1741_v58 = vadd.f32 %v1911_v51, %v1729_v55 }
 0x463   :  { %v1692_v59 = vpop.f32.mrf.mxu0  ;;  %v1732_v60 = vpop.f32.mrf.mxu1 }
 0x464   :  { %1742 = vst [vmem:[#allocation19] sm:$0xff] %v1741_v58 }
 0x465   :  { %2446 = shalt.err (!%p2443_p12)
}
 0x466   :  { %1752 = dma.vmem_to_hbm [thread:$0]  %s1750_s25, 128, %s2651_s15, [#allocation4]  }
 0x467   :  { %2467 = dma.done.wait [#allocation4], 128  }
 0x468   :  { %2468 = vsyncadd [#allocation4], 4294967168 }
 0x469   :  { %1756 = vsyncpa [#allocation3], 1 }
 0x46a   :  { %1757 = vsyncpa [#allocation6], 1 }
 0x46b   :  { %1758 = vsyncpa [#allocation9], 1 }
 0x46c   :  { %1759 = vsyncpa [#allocation12], 1 }
 0x46d   :  { %1760 = vsyncpa [#allocation15], 1 }
 0x46e   :  { %1761 = vsyncpa [#allocation18], 1 }
 0x46f   :  { %1762 = vsyncpa [#allocation4], 1 }

</bundles_post_ra>
